<compile_context>
chip_gen: v7x
topology: tpu7x:2x2x1
jax: 0.10.0
libtpu: 0.0.40
codegen_flags: <defaults>
</compile_context>

<pallas_src>
import functools

import jax
import jax.numpy as jnp
from jax import lax
from jax.experimental import pallas as pl
from jax.experimental.pallas import tpu as pltpu

BN_EPS = 1e-5
LANE = 128          # pad feature / class dims to the 128-lane vreg width
NEG = -1e30         # mask for padded class columns before log_softmax

# A_hat is kept VMEM-resident when 2 copies of it (+ scratches/weights) fit
# this budget.  48 MiB is conservative enough to also hold on v7x (64 MiB).
A_RESIDENT_BUDGET = 48 * 1024 * 1024


def _round_up(v, m):
    return (v + m - 1) // m * m


# ------------------------------ Pallas kernel ------------------------------
#
# grid = (num_layers, num_row_tiles); layer outer, row tile inner. Both axes
# are sequential ("arbitrary"): layer l+1 needs every row tile of layer l, and
# row tiles share the per-layer `lin` scratch.
def gcn_fused_kernel(a_ref, x_hbm, w_ref, b_ref, t_ref, o_ref, h_ref, lin_ref,
                     *, a_resident, lin_chunk, lin_unroll):
    l = pl.program_id(0)
    r = pl.program_id(1)
    last = pl.num_programs(0) - 1
    tm = o_ref.shape[0]
    n_pad = h_ref.shape[0]

    # First grid step: DMA the input X (left in HBM via pl.ANY) into the
    # resident activation scratch.  X is read exactly once, so it does not pin
    # any VMEM for the rest of the kernel.
    @pl.when(jnp.logical_and(l == 0, r == 0))
    def _():
        pltpu.sync_copy(x_hbm, h_ref)

    # Once per layer: dense linear transform of ALL nodes, chunked over rows
    # so the live f32 temporary stays at (lin_chunk, D) and the bf16 cast +
    # store pipeline with the MXU instead of materialising an (N, D) f32 blob.
    @pl.when(r == 0)
    def _():
        n_chunks = n_pad // lin_chunk

        def body(c, carry):
            off = pl.multiple_of(c * lin_chunk, lin_chunk)
            blk = jnp.dot(h_ref[pl.ds(off, lin_chunk), :], w_ref[...],
                          preferred_element_type=jnp.float32) + b_ref[...]
            lin_ref[pl.ds(off, lin_chunk), :] = blk.astype(lin_ref.dtype)
            return carry

        lax.fori_loop(0, n_chunks, body, 0, unroll=lin_unroll)

    # Aggregation for this row strip: A_hat[rows, :] @ lin.
    if a_resident:
        a_block = a_ref[pl.ds(pl.multiple_of(r * tm, tm), tm), :]
    else:
        a_block = a_ref[...]
    agg = jnp.dot(a_block, lin_ref[...], preferred_element_type=jnp.float32)
    y = agg + t_ref[...]        # BN shift (hidden) / padded-class mask (last)

    @pl.when(l != last)
    def _():
        act = jnp.maximum(y, 0.0)                               # ReLU
        h_ref[pl.ds(pl.multiple_of(r * tm, tm), tm), :] = act.astype(h_ref.dtype)
        # NOTE: o_ref is deliberately NOT written for hidden layers; the final
        # layer fully overwrites every output block.

    @pl.when(l == last)
    def _():
        m = jnp.max(y, axis=-1, keepdims=True)
        z = y - m
        lse = jnp.log(jnp.sum(jnp.exp(z), axis=-1, keepdims=True))
        o_ref[...] = z - lse                                    # log_softmax


def gcn_fused_call(a_hat, x, w_all, b_all, t_all, *, row_tile):
    n_pad, d_pad = x.shape
    num_layers = w_all.shape[0]
    tm = row_tile
    num_row_tiles = n_pad // tm

    # --- VMEM accounting (conservative: 2 buffers per pipelined operand) ----
    a_bytes = n_pad * n_pad * a_hat.dtype.itemsize
    scratch_bytes = 2 * n_pad * d_pad * 2                       # h + lin, bf16
    w_bytes = 2 * d_pad * d_pad * w_all.dtype.itemsize
    vec_bytes = 2 * 2 * d_pad * 4                               # b, t blocks
    out_bytes = 2 * tm * d_pad * 4
    base = scratch_bytes + w_bytes + vec_bytes + out_bytes + (64 << 10)

    a_resident = (base + 2 * a_bytes) <= A_RESIDENT_BUDGET
    a_vmem = 2 * a_bytes if a_resident else 2 * tm * n_pad * a_hat.dtype.itemsize
    vmem_needed = base + a_vmem
    vmem_limit = int(min(max(vmem_needed + (8 << 20), 16 << 20), 100 << 20))

    # Row-chunking of the per-layer linear transform.
    lin_chunk = min(256, n_pad)
    while n_pad % lin_chunk:
        lin_chunk //= 2
    lin_unroll = (n_pad // lin_chunk) <= 8

    a_spec = (pl.BlockSpec((n_pad, n_pad), lambda l, r: (0, 0)) if a_resident
              else pl.BlockSpec((tm, n_pad), lambda l, r: (r, 0)))

    # --- honest cost estimate -----------------------------------------------
    flops = num_layers * (2 * n_pad * n_pad * d_pad + 2 * n_pad * d_pad * d_pad)
    a_reads = (1 if a_resident else num_layers) * a_bytes
    bytes_accessed = (a_reads
                      + x.size * x.dtype.itemsize
                      + w_all.size * w_all.dtype.itemsize
                      + (b_all.size + t_all.size) * 4
                      + num_layers * n_pad * d_pad * 4)         # out writebacks

    kernel = functools.partial(gcn_fused_kernel,
                               a_resident=a_resident,
                               lin_chunk=lin_chunk,
                               lin_unroll=lin_unroll)

    return pl.pallas_call(
        kernel,
        out_shape=jax.ShapeDtypeStruct((n_pad, d_pad), jnp.float32),
        grid_spec=pltpu.PrefetchScalarGridSpec(
            num_scalar_prefetch=0,
            grid=(num_layers, num_row_tiles),
            in_specs=[
                a_spec,                                              # A_hat
                pl.BlockSpec(memory_space=pl.ANY),                   # X (HBM)
                pl.BlockSpec((None, d_pad, d_pad), lambda l, r: (l, 0, 0)),  # W'_l
                pl.BlockSpec((None, 1, d_pad), lambda l, r: (l, 0, 0)),      # b'_l
                pl.BlockSpec((None, 1, d_pad), lambda l, r: (l, 0, 0)),      # t_l
            ],
            out_specs=pl.BlockSpec((tm, d_pad), lambda l, r: (r, 0)),
            scratch_shapes=[
                pltpu.VMEM((n_pad, d_pad), jnp.bfloat16),   # H  (activations)
                pltpu.VMEM((n_pad, d_pad), jnp.bfloat16),   # lin = H @ W' + b'
            ],
        ),
        compiler_params=pltpu.CompilerParams(
            # TODO(synk): on v7x the row axis could be made core-parallel by
            # recomputing `lin` per core instead of sharing the scratch.
            dimension_semantics=("arbitrary", "arbitrary"),
            vmem_limit_bytes=vmem_limit,
        ),
        cost_estimate=pl.CostEstimate(
            flops=flops,
            transcendentals=n_pad * d_pad,
            bytes_accessed=bytes_accessed,
        ),
    )(a_hat, x, w_all, b_all, t_all)


# ------------------------------ plain-JAX glue ------------------------------

def build_normalized_adjacency(edge_index, num_nodes, n_pad):
    """Dense A_hat = D^-1/2 (A + I) D^-1/2 as in GCNLayer (directed=False,
    self_loop=True, edge_weight = ones). Degrees count target occurrences
    (incl. self loops); duplicate edges sum; the given (possibly asymmetric)
    edge list is NOT symmetrised — exactly like the reference. Padded rows and
    columns are zero. Returned in bf16 (f32 accumulation happens on the MXU)."""
    loops = jnp.arange(num_nodes, dtype=edge_index.dtype)
    row = jnp.concatenate([edge_index[0], loops])
    col = jnp.concatenate([edge_index[1], loops])

    deg = jnp.zeros((num_nodes,), jnp.float32).at[col].add(1.0)
    dis = jnp.where(deg > 0, jax.lax.rsqrt(deg), 0.0)
    norm = dis[row] * dis[col]

    # out[i] = sum over edges (j -> i): norm_e * x[j]  =>  A_hat[col, row]
    a_hat = jnp.zeros((n_pad, n_pad), jnp.float32)
    a_hat = a_hat.at[col, row].add(norm)
    return a_hat.astype(jnp.bfloat16)


def prepare_layer_stack(params, hidden_dim, output_dim, d_pad):
    """Fold eval-mode BatchNorm into the linear, pad to d_pad lanes and stack
    per-layer weights so the kernel can index them with the layer grid axis."""
    ws, bs, ts = [], [], []
    for conv, bn in zip(params["convs"], params["bns"]):
        s = bn["gamma"] * jax.lax.rsqrt(bn["var"] + BN_EPS)   # (1, hidden)
        w_t = conv["w_t"] * s                                 # scale output cols
        b = conv["b"] * s
        t = bn["beta"] - bn["mean"] * s
        d_in = w_t.shape[0]
        ws.append(jnp.pad(w_t, ((0, d_pad - d_in), (0, d_pad - hidden_dim))))
        bs.append(jnp.pad(b, ((0, 0), (0, d_pad - hidden_dim))))
        ts.append(jnp.pad(t, ((0, 0), (0, d_pad - hidden_dim))))

    w_last = params["last_conv"]["w_t"]                       # (d_in, output_dim)
    b_last = params["last_conv"]["b"]
    ws.append(jnp.pad(w_last,
                      ((0, d_pad - w_last.shape[0]), (0, d_pad - output_dim))))
    bs.append(jnp.pad(b_last, ((0, 0), (0, d_pad - output_dim))))
    # Mask padded class columns so they vanish from the log_softmax.
    ts.append(jnp.concatenate(
        [jnp.zeros((1, output_dim), jnp.float32),
         jnp.full((1, d_pad - output_dim), NEG, jnp.float32)], axis=-1))

    w_all = jnp.stack(ws).astype(jnp.bfloat16)   # (L, d_pad, d_pad)
    b_all = jnp.stack(bs).astype(jnp.float32)    # (L, 1, d_pad)
    t_all = jnp.stack(ts).astype(jnp.float32)    # (L, 1, d_pad)
    return w_all, b_all, t_all


def init_gcn_params(key, input_dim, hidden_dim, output_dim, num_layers):
    """Deterministic synthetic parameter init (shapes match the PyTorch module)."""
    params = {"convs": [], "bns": []}
    dims_in = [input_dim] + [hidden_dim] * (num_layers - 2)
    for d_in in dims_in:
        key, k1, k2 = jax.random.split(key, 3)
        w = jax.random.uniform(k1, (hidden_dim, d_in), jnp.float32, -0.1, 0.1)
        b = jax.random.uniform(k2, (1, hidden_dim), jnp.float32, -0.1, 0.1)
        params["convs"].append({"w_t": w.T, "b": b})
        key, k3, k4 = jax.random.split(key, 3)
        params["bns"].append({
            "gamma": 1.0 + 0.1 * jax.random.normal(k3, (1, hidden_dim), jnp.float32),
            "beta": 0.1 * jax.random.normal(k4, (1, hidden_dim), jnp.float32),
            "mean": jnp.zeros((1, hidden_dim), jnp.float32),
            "var": jnp.ones((1, hidden_dim), jnp.float32),
        })
    key, k5, k6 = jax.random.split(key, 3)
    w_last = jax.random.uniform(k5, (output_dim, hidden_dim), jnp.float32, -0.1, 0.1)
    b_last = jax.random.uniform(k6, (1, output_dim), jnp.float32, -0.1, 0.1)
    params["last_conv"] = {"w_t": w_last.T, "b": b_last}
    return params


@functools.partial(jax.jit, static_argnames=("num_nodes",))
def gcn_forward(params, x, edge_index, num_nodes):
    input_dim = x.shape[1]
    hidden_dim = (params["convs"][0]["w_t"].shape[1]
                  if params["convs"] else input_dim)
    output_dim = params["last_conv"]["w_t"].shape[1]

    # 256-row tiles for larger graphs (v6e 2x256x256 MXU), 128 for small ones.
    row_tile = 256 if _round_up(num_nodes, 256) >= 1024 else 128
    d_pad = _round_up(max(input_dim, hidden_dim, output_dim), LANE)
    n_pad = _round_up(num_nodes, row_tile)

    a_hat = build_normalized_adjacency(edge_index, num_nodes, n_pad)
    x_p = jnp.pad(x, ((0, n_pad - num_nodes),
                      (0, d_pad - input_dim))).astype(jnp.bfloat16)
    w_all, b_all, t_all = prepare_layer_stack(params, hidden_dim, output_dim, d_pad)

    out = gcn_fused_call(a_hat, x_p, w_all, b_all, t_all, row_tile=row_tile)
    # dropout is identity in eval mode
    return out[:num_nodes, :output_dim]


def gcn_reference(params, x, edge_index, num_nodes):
    """Plain-JAX f32 reference of the eval-mode PyTorch forward (tolerance check)."""
    loops = jnp.arange(num_nodes, dtype=edge_index.dtype)
    row = jnp.concatenate([edge_index[0], loops])
    col = jnp.concatenate([edge_index[1], loops])
    deg = jnp.zeros((num_nodes,), jnp.float32).at[col].add(1.0)
    dis = jnp.where(deg > 0, jax.lax.rsqrt(deg), 0.0)
    norm = dis[row] * dis[col]
    a_hat = jnp.zeros((num_nodes, num_nodes), jnp.float32).at[col, row].add(norm)

    h = x
    for conv, bn in zip(params["convs"], params["bns"]):
        h = a_hat @ (h @ conv["w_t"] + conv["b"])
        h = (h - bn["mean"]) * jax.lax.rsqrt(bn["var"] + BN_EPS) * bn["gamma"] + bn["beta"]
        h = jnp.maximum(h, 0.0)
    h = a_hat @ (h @ params["last_conv"]["w_t"] + params["last_conv"]["b"])
    return jax.nn.log_softmax(h, axis=-1)


# ---------------------------------- main ----------------------------------

if __name__ == "__main__":
    key = jax.random.PRNGKey(0)

    num_nodes = 16
    input_dim = 32
    hidden_dim = 32
    output_dim = 8
    num_layers = 3
    num_edges = 40

    key, kx, ke, kp = jax.random.split(key, 4)
    x = jax.random.normal(kx, (num_nodes, input_dim), jnp.float32)
    edge_index = jax.random.randint(ke, (2, num_edges), 0, num_nodes, jnp.int32)

    params = init_gcn_params(kp, input_dim, hidden_dim, output_dim, num_layers)

    out = gcn_forward(params, x, edge_index, num_nodes)
    out = jax.block_until_ready(out)

    assert out.shape == (num_nodes, output_dim)
    # log_softmax rows should (approximately) sum to 1 in prob space
    assert jnp.allclose(jnp.sum(jnp.exp(out), axis=-1), 1.0, atol=1e-4)
    assert bool(jnp.all(jnp.isfinite(out)))

    # bf16 activations/weights vs. the f32 reference: loose tolerance check.
    ref = gcn_reference(params, x, edge_index, num_nodes)
    assert jnp.allclose(out, ref, atol=0.1), float(jnp.max(jnp.abs(out - ref)))

    print("KERNEL_OK")
</pallas_src>

<mosaic_0001>
module attributes {stable_mosaic.version = 11 : i64} {
  func.func @gcn_fused_kernel(%arg0: i32, %arg1: i32, %arg2: memref<128x128xbf16, #tpu.memory_space<vmem>>, %arg3: memref<128x128xbf16, #tpu.memory_space<any>>, %arg4: memref<1x128x128xbf16, #tpu.memory_space<vmem>>, %arg5: memref<1x1x128xf32, #tpu.memory_space<vmem>>, %arg6: memref<1x1x128xf32, #tpu.memory_space<vmem>>, %arg7: memref<128x128xf32, #tpu.memory_space<vmem>>, %arg8: memref<128x128xbf16, #tpu.memory_space<vmem>>, %arg9: memref<128x128xbf16, #tpu.memory_space<vmem>>) attributes {dimension_semantics = [#tpu.dimension_semantics<arbitrary>, #tpu.dimension_semantics<arbitrary>], iteration_bounds = array<i64: 3, 1>, scalar_prefetch = 0 : i64, scratch_operands = 2 : i64, tpu.core_type = #tpu.core_type<tc>, window_params = [{pipeline_mode = #tpu.pipeline_mode<synchronous>, transform_indices = @transform_0, window_bounds = array<i64: 128, 128>}, {}, {transform_indices = @transform_2, window_bounds = array<i64: 1, 128, 128>}, {transform_indices = @transform_3, window_bounds = array<i64: 1, 1, 128>}, {transform_indices = @transform_4, window_bounds = array<i64: 1, 1, 128>}, {transform_indices = @transform_5, window_bounds = array<i64: 128, 128>}]} {
    %c0_i32 = arith.constant 0 : i32
    %0 = arith.cmpi eq, %arg0, %c0_i32 : i32
    %c0_i32_0 = arith.constant 0 : i32
    %1 = arith.cmpi eq, %arg1, %c0_i32_0 : i32
    %2 = arith.andi %0, %1 : i1
    %3 = arith.extui %2 : i1 to i32
    %c0_i32_1 = arith.constant 0 : i32
    %4 = arith.cmpi ne, %3, %c0_i32_1 : i32
    scf.if %4 {
      "tpu.region"() ({
        %24 = tpu.sem_alloc : memref<!tpu.dma_semaphore, #tpu.memory_space<semaphore_mem>>
        tpu.enqueue_dma source(%arg3 : memref<128x128xbf16, #tpu.memory_space<any>>) target(%arg8 : memref<128x128xbf16, #tpu.memory_space<vmem>>) target_semaphore(%24 : memref<!tpu.dma_semaphore, #tpu.memory_space<semaphore_mem>>)
        tpu.wait_dma2 semaphore(%24 : memref<!tpu.dma_semaphore, #tpu.memory_space<semaphore_mem>>) src(%arg3 : memref<128x128xbf16, #tpu.memory_space<any>>) dst(%arg8 : memref<128x128xbf16, #tpu.memory_space<vmem>>)
        tpu.yield
      }) : () -> ()
    } else {
    }
    %c0_i32_2 = arith.constant 0 : i32
    %5 = arith.cmpi eq, %arg1, %c0_i32_2 : i32
    %6 = arith.extui %5 : i1 to i32
    %c0_i32_3 = arith.constant 0 : i32
    %7 = arith.cmpi ne, %6, %c0_i32_3 : i32
    scf.if %7 {
      %c0_i32_12 = arith.constant 0 : i32
      %c128_i32_13 = arith.constant 128 : i32
      %24 = arith.muli %c0_i32_12, %c128_i32_13 : i32
      %25 = tpu.assume_multiple %24, 128 : i32
      %26 = arith.index_cast %25 : i32 to index
      %c0_14 = arith.constant 0 : index
      %27 = vector.load %arg8[%26, %c0_14] : memref<128x128xbf16, #tpu.memory_space<vmem>>, vector<128x128xbf16>
      %c0_15 = arith.constant 0 : index
      %c0_16 = arith.constant 0 : index
      %c0_17 = arith.constant 0 : index
      %28 = vector.load %arg4[%c0_15, %c0_16, %c0_17] : memref<1x128x128xbf16, #tpu.memory_space<vmem>>, vector<1x128x128xbf16>
      %29 = vector.shape_cast %28 : vector<1x128x128xbf16> to vector<128x128xbf16>
      %cst_18 = arith.constant dense<0.000000e+00> : vector<128x128xf32>
      %30 = tpu.matmul %27, %29, %cst_18 {dimension_numbers = #tpu.dot_dimension_numbers<[1], [0], [0], [1], [0, 0, 1, 1], [], []>} : vector<128x128xbf16>, vector<128x128xbf16>, vector<128x128xf32> -> vector<128x128xf32>
      %c0_19 = arith.constant 0 : index
      %c0_20 = arith.constant 0 : index
      %c0_21 = arith.constant 0 : index
      %31 = vector.load %arg5[%c0_19, %c0_20, %c0_21] : memref<1x1x128xf32, #tpu.memory_space<vmem>>, vector<1x1x128xf32>
      %32 = vector.shape_cast %31 : vector<1x1x128xf32> to vector<1x128xf32>
      %33 = vector.broadcast %32 : vector<1x128xf32> to vector<128x128xf32>
      %34 = arith.addf %30, %33 : vector<128x128xf32>
      %35 = arith.truncf %34 : vector<128x128xf32> to vector<128x128xbf16>
      %36 = arith.index_cast %25 : i32 to index
      %c0_22 = arith.constant 0 : index
      %37 = vector.load %arg9[%36, %c0_22] : memref<128x128xbf16, #tpu.memory_space<vmem>>, vector<128x128xbf16>
      tpu.vector_store %arg9[%36, %c0_22], %35 {strides = array<i32>} : memref<128x128xbf16, #tpu.memory_space<vmem>>, vector<128x128xbf16>,
      %c1_i32 = arith.constant 1 : i32
    } else {
    }
    %c128_i32 = arith.constant 128 : i32
    %8 = arith.muli %arg1, %c128_i32 : i32
    %9 = tpu.assume_multiple %8, 128 : i32
    %10 = arith.index_cast %9 : i32 to index
    %c0 = arith.constant 0 : index
    %11 = vector.load %arg2[%10, %c0] : memref<128x128xbf16, #tpu.memory_space<vmem>>, vector<128x128xbf16>
    %c0_4 = arith.constant 0 : index
    %c0_5 = arith.constant 0 : index
    %12 = vector.load %arg9[%c0_4, %c0_5] : memref<128x128xbf16, #tpu.memory_space<vmem>>, vector<128x128xbf16>
    %cst = arith.constant dense<0.000000e+00> : vector<128x128xf32>
    %13 = tpu.matmul %11, %12, %cst {dimension_numbers = #tpu.dot_dimension_numbers<[1], [0], [0], [1], [0, 0, 1, 1], [], []>} : vector<128x128xbf16>, vector<128x128xbf16>, vector<128x128xf32> -> vector<128x128xf32>
    %c0_6 = arith.constant 0 : index
    %c0_7 = arith.constant 0 : index
    %c0_8 = arith.constant 0 : index
    %14 = vector.load %arg6[%c0_6, %c0_7, %c0_8] : memref<1x1x128xf32, #tpu.memory_space<vmem>>, vector<1x1x128xf32>
    %15 = vector.shape_cast %14 : vector<1x1x128xf32> to vector<1x128xf32>
    %16 = vector.broadcast %15 : vector<1x128xf32> to vector<128x128xf32>
    %17 = arith.addf %13, %16 : vector<128x128xf32>
    %c2_i32 = arith.constant 2 : i32
    %18 = arith.cmpi ne, %arg0, %c2_i32 : i32
    %19 = arith.extui %18 : i1 to i32
    %c0_i32_9 = arith.constant 0 : i32
    %20 = arith.cmpi ne, %19, %c0_i32_9 : i32
    scf.if %20 {
      %cst_12 = arith.constant 0.000000e+00 : f32
      %24 = vector.broadcast %cst_12 : f32 to vector<128x128xf32>
      %25 = arith.maximumf %17, %24 : vector<128x128xf32>
      %26 = arith.truncf %25 : vector<128x128xf32> to vector<128x128xbf16>
      %c128_i32_13 = arith.constant 128 : i32
      %27 = arith.muli %arg1, %c128_i32_13 : i32
      %28 = tpu.assume_multiple %27, 128 : i32
      %29 = arith.index_cast %28 : i32 to index
      %c0_14 = arith.constant 0 : index
      %30 = vector.load %arg8[%29, %c0_14] : memref<128x128xbf16, #tpu.memory_space<vmem>>, vector<128x128xbf16>
      tpu.vector_store %arg8[%29, %c0_14], %26 {strides = array<i32>} : memref<128x128xbf16, #tpu.memory_space<vmem>>, vector<128x128xbf16>,
    } else {
    }
    %c2_i32_10 = arith.constant 2 : i32
    %21 = arith.cmpi eq, %arg0, %c2_i32_10 : i32
    %22 = arith.extui %21 : i1 to i32
    %c0_i32_11 = arith.constant 0 : i32
    %23 = arith.cmpi ne, %22, %c0_i32_11 : i32
    scf.if %23 {
      %cst_12 = arith.constant dense<0xFF800000> : vector<128xf32>
      %24 = vector.multi_reduction <maximumf>, %17, %cst_12 [1] : vector<128x128xf32> to vector<128xf32>
      %25 = vector.shape_cast %24 : vector<128xf32> to vector<128x1xf32>
      %26 = vector.broadcast %25 : vector<128x1xf32> to vector<128x128xf32>
      %27 = arith.subf %17, %26 : vector<128x128xf32>
      %28 = math.exp %27 : vector<128x128xf32>
      %cst_13 = arith.constant dense<0.000000e+00> : vector<128xf32>
      %29 = vector.multi_reduction <add>, %28, %cst_13 [1] : vector<128x128xf32> to vector<128xf32>
      %30 = vector.shape_cast %29 : vector<128xf32> to vector<128x1xf32>
      %31 = math.log %30 : vector<128x1xf32>
      %32 = vector.broadcast %31 : vector<128x1xf32> to vector<128x128xf32>
      %33 = arith.subf %27, %32 : vector<128x128xf32>
      %c0_14 = arith.constant 0 : index
      %c0_15 = arith.constant 0 : index
      %34 = vector.load %arg7[%c0_14, %c0_15] : memref<128x128xf32, #tpu.memory_space<vmem>>, vector<128x128xf32>
      tpu.vector_store %arg7[%c0_14, %c0_15], %33 {strides = array<i32>} : memref<128x128xf32, #tpu.memory_space<vmem>>, vector<128x128xf32>,
    } else {
    }
    return
  }
  func.func @transform_0(%arg0: i32, %arg1: i32) -> (i32, i32) {
    %c0_i32 = arith.constant 0 : i32
    %c0_i32_0 = arith.constant 0 : i32
    %c0_i32_1 = arith.constant 0 : i32
    return %c0_i32, %c0_i32_0 : i32, i32
  }
  func.func @transform_2(%arg0: i32, %arg1: i32) -> (i32, i32, i32) {
    %c0_i32 = arith.constant 0 : i32
    %c0_i32_0 = arith.constant 0 : i32
    %c0_i32_1 = arith.constant 0 : i32
    return %arg0, %c0_i32, %c0_i32_0 : i32, i32, i32
  }
  func.func @transform_3(%arg0: i32, %arg1: i32) -> (i32, i32, i32) {
    %c0_i32 = arith.constant 0 : i32
    %c0_i32_0 = arith.constant 0 : i32
    %c0_i32_1 = arith.constant 0 : i32
    return %arg0, %c0_i32, %c0_i32_0 : i32, i32, i32
  }
  func.func @transform_4(%arg0: i32, %arg1: i32) -> (i32, i32, i32) {
    %c0_i32 = arith.constant 0 : i32
    %c0_i32_0 = arith.constant 0 : i32
    %c0_i32_1 = arith.constant 0 : i32
    return %arg0, %c0_i32, %c0_i32_0 : i32, i32, i32
  }
  func.func @transform_5(%arg0: i32, %arg1: i32) -> (i32, i32) {
    %c0_i32 = arith.constant 0 : i32
    %c0_i32_0 = arith.constant 0 : i32
    return %arg1, %c0_i32 : i32, i32
  }
}

</mosaic_0001>

<bundles_post_ra>
// kernel: mul.15
= control target key start
LH: loop header
LB: loop body
LE: loop exit
PB: predicated region body
PF: predicated region fallthrough
CT: control target
= control target key end

     0   :  { %s34_s0 = inlined_call_operand.vmem [shape: f32[56], index: 0, kind: input, shape index: {}]   ;;  %s35_s1 = inlined_call_operand.vmem [shape: f32[56], index: 1, kind: input, shape index: {}]   ;;  %s36_s2 = inlined_call_operand.vmem [shape: f32[56], index: 2, kind: output, shape index: {}]  }
   0x1   :  { %v3_v0 = vld [vmem:[%s34_s0] sm:$0x1] }
   0x2   :  { %v4_v1 = vld [vmem:[%s35_s1] sm:$0x1] }
   0x3   :  { %v7_v2 = vmul.f32 %v4_v1, %v3_v0 }
   0x5   :  { %9 = vst [vmem:[%s36_s2] sm:$0x1] %v7_v2 }

// kernel: gcn_forward.1
= control target key start
LH: loop header
LB: loop body
LE: loop exit
PB: predicated region body
PF: predicated region fallthrough
CT: control target
= control target key end

     0   :  { %s1284_s18 = smov 0   ;;  %s1286_s19 = smov 0   ;;  %s1592_s0 = inlined_call_operand.vmem [shape: bf16[128,128], index: 0, kind: input, shape index: {}]   ;;  %s1593_s1 = inlined_call_operand.vmem [shape: bf16[128,128], index: 1, kind: input, shape index: {}]   ;;  %s1594_s2 = inlined_call_operand.vmem [shape: bf16[3,128,128], index: 2, kind: input, shape index: {}]   ;;  %s1595_s3 = inlined_call_operand.vmem [shape: f32[3,1,128], index: 3, kind: input, shape index: {}]   ;;  %s1596_s4 = inlined_call_operand.vmem [shape: f32[3,1,128], index: 4, kind: input, shape index: {}]   ;;  %s1597_s5 = inlined_call_operand.vmem [shape: f32[128,128], index: 5, kind: output, shape index: {}]  }
   0x1   :  { %s1288_s20 = smov 0  }
   0x2 LB: > { %s27_s21 = sadd.s32 1, %s1248_s19  ;;  %p998_p0 = scmp.ge.s32.totalorder %s1252_s20, 1  ;;  %s1252_s20 = sphi %s1288_s20, %s15_s20   ;;  %s1248_s19 = sphi %s1286_s19, %s1599_s19   ;;  %s1244_s18 = sphi %s1284_s18, %s1598_s18  }
   0x3   : > { %p29_p1 = scmp.ge.s32.totalorder %s27_s21, 3  ;;  %p191_p2 = scmp.lt.s32.totalorder %s1252_s20, 4 }
   0x5   : > { %s1601_s21 = smov (%p29_p1, %s27_s21), 0  ;;  %p192_p3 = pnand %p998_p0, %p191_p2 }
   0x6   : > { %p223_p4 = scmp.lt.s32.totalorder (!%p192_p3), %s1244_s18, 2  ;;  %p241_p5 = scmp.eq.s32.totalorder (!%p192_p3), %s1244_s18, 0 }
   0x7   : > { %195 = sbr.rel (%p192_p3) target bundleno = 908 (0x38c), region = 36 }
   0xe   : > { %s1307_s22 = scalar_select %p223_p4, %s1244_s18, 2 }
   0xf   : > { %246 = sbr.rel (!%p241_p5) target bundleno = 30 (0x1e), region = 40 }
  0x10   : > { %s1026_s23 = sshll.u32 %s1307_s22, 6  ;;  %s230_s26 = scalar_lea.vmem %s1595_s3, %s1307_s22 }
  0x11   : > { %s1317_s29 = scalar_lea.vmem %s1594_s2, %s1026_s23  ;;  %s233_s7 = scalar_lea.vmem %s1596_s4, %s1307_s22 }
  0x16   : > { %v279_v0 = vld [vmem:[%s1593_s1] sm:$0xff]  ;;  %v281_v1 = vld [vmem:[%s1593_s1 + $0x8] sm:$0xff]  ;;  %v283_v2 = vld [vmem:[%s1593_s1 + $0x10] sm:$0xff] }
  0x17   : > { %280 = vst [vmem:[#allocation2] sm:$0xff] %v279_v0  ;;  %282 = vst [vmem:[#allocation2 + $0x8] sm:$0xff] %v281_v1  ;;  %v285_v3 = vld [vmem:[%s1593_s1 + $0x18] sm:$0xff]  ;;  %v287_v4 = vld [vmem:[%s1593_s1 + $0x20] sm:$0xff] }
  0x18   : > { %284 = vst [vmem:[#allocation2 + $0x10] sm:$0xff] %v283_v2  ;;  %v289_v5 = vld [vmem:[%s1593_s1 + $0x28] sm:$0xff]  ;;  %286 = vst [vmem:[#allocation2 + $0x18] sm:$0xff] %v285_v3  ;;  %v291_v6 = vld [vmem:[%s1593_s1 + $0x30] sm:$0xff] }
  0x19   : > { %288 = vst [vmem:[#allocation2 + $0x20] sm:$0xff] %v287_v4  ;;  %290 = vst [vmem:[#allocation2 + $0x28] sm:$0xff] %v289_v5  ;;  %v293_v7 = vld [vmem:[%s1593_s1 + $0x38] sm:$0xff] }
  0x1a   : > { %292 = vst [vmem:[#allocation2 + $0x30] sm:$0xff] %v291_v6  ;;  %294 = vst [vmem:[#allocation2 + $0x38] sm:$0xff] %v293_v7 }
  0x1b   : > { %302 = vsyncadd [#allocation4], 1024 }
  0x1c   : > { %1240 = dma.done.wait [#allocation4], 1024 }
  0x1d   : > { %1241 = vsyncadd [#allocation4], 4294966272 }
  0x1e PF: > { %v1148_v8 = vld [vmem:[%s1317_s29] sm:$0xff]   ;;  %v1149_v9 = vld [vmem:[%s1317_s29 + $0x8] sm:$0xff]   ;;  %v1150_v10 = vld [vmem:[%s1317_s29 + $0x10] sm:$0xff]   ;;  %p1020_p6 = scmp.eq.s32.totalorder %s1244_s18, 2 }
  0x1f   : > { %1060 = vmatprep.subr.bf16.mxu0 %v1148_v8  ;;  %v1151_v11 = vld [vmem:[%s1317_s29 + $0x18] sm:$0xff]   ;;  %v310_v12 = vld [vmem:[#allocation2] sm:$0xff]  ;;  %v1153_v14 = vld [vmem:[%s1317_s29 + $0x28] sm:$0xff]  }
  0x20   : > { %1061 = vmatpush3.bf16.msra.mxu0 %v1148_v8  ;;  %1076 = vmatprep.mubr.bf16.mxu0 %v310_v12  ;;  %v1152_v13 = vld [vmem:[%s1317_s29 + $0x20] sm:$0xff]   ;;  %v1154_v15 = vld [vmem:[%s1317_s29 + $0x30] sm:$0xff]   ;;  %v1155_v16 = vld [vmem:[%s1317_s29 + $0x38] sm:$0xff]  }
  0x21   : > { %1062 = vmatprep.subr.bf16.mxu0 %v1149_v9  ;;  %v311_v17 = vld [vmem:[#allocation2 + $0x8] sm:$0xff]  ;;  %v312_v18 = vld [vmem:[#allocation2 + $0x10] sm:$0xff]  ;;  %v313_v19 = vld [vmem:[#allocation2 + $0x18] sm:$0xff] }
  0x22   : > { %v314_v20 = vld [vmem:[#allocation2 + $0x20] sm:$0xff]  ;;  %v315_v21 = vld [vmem:[#allocation2 + $0x28] sm:$0xff]  ;;  %v316_v22 = vld [vmem:[#allocation2 + $0x30] sm:$0xff] }
  0x23   : > { %v317_v23 = vld [vmem:[#allocation2 + $0x38] sm:$0xff]  ;;  %v1156_v24 = vld [vmem:[%s1592_s0] sm:$0xff]   ;;  %v1157_v2 = vld [vmem:[%s1592_s0 + $0x8] sm:$0xff]  }
  0x24   : > { %1063 = vmatpush3.bf16.msra.mxu0 %v1149_v9  ;;  %1108 = vmatprep.mubr.bf16.mxu1 %v1156_v24  ;;  %v1002_v26 = vld [vmem:[%s230_s26] ss:$0 sm:$0xff]  ;;  %v1158_v3 = vld [vmem:[%s1592_s0 + $0x10] sm:$0xff]   ;;  %v1159_v4 = vld [vmem:[%s1592_s0 + $0x18] sm:$0xff]  }
  0x25   : > { %1064 = vmatprep.subr.bf16.mxu0 %v1150_v10  ;;  %v1160_v5 = vld [vmem:[%s1592_s0 + $0x20] sm:$0xff]   ;;  %v1161_v6 = vld [vmem:[%s1592_s0 + $0x28] sm:$0xff]   ;;  %v1162_v7 = vld [vmem:[%s1592_s0 + $0x30] sm:$0xff]  }
  0x26   : > { %v1163_v8 = vld [vmem:[%s1592_s0 + $0x38] sm:$0xff]   ;;  %v1011_v9 = vld [vmem:[%s233_s7] ss:$0 sm:$0xff] }
  0x28   : > { %1065 = vmatpush3.bf16.msra.mxu0 %v1150_v10 }
  0x29   : > { %1066 = vmatprep.subr.bf16.mxu0 %v1151_v11 }
  0x2c   : > { %1067 = vmatpush3.bf16.msra.mxu0 %v1151_v11 }
  0x2d   : > { %1068 = vmatprep.subr.bf16.mxu0 %v1152_v13 }
  0x30   : > { %1069 = vmatpush3.bf16.msra.mxu0 %v1152_v13 }
  0x31   : > { %1070 = vmatprep.subr.bf16.mxu0 %v1153_v14 }
  0x34   : > { %1071 = vmatpush3.bf16.msra.mxu0 %v1153_v14 }
  0x35   : > { %1072 = vmatprep.subr.bf16.mxu0 %v1154_v15 }
  0x38   : > { %1073 = vmatpush3.bf16.msra.mxu0 %v1154_v15 }
  0x39   : > { %1074 = vmatprep.subr.bf16.mxu0 %v1155_v16 }
  0x3c   : > { %1075 = vmatpush3.bf16.msra.mxu0 %v1155_v16 }
  0x3f   : > { %1077 = vmatmul.mubr.bf16.vlgmr.msra.gmra.mrb[0].mxu0 %v311_v17 }
  0x40   : > { %1080 = vmatprep.mubr.bf16.mxu0 %v312_v18 }
  0x47   : > { %1081 = vmatmul.mubr.bf16.gmra.mrb[4].mxu0 %v313_v19 }
  0x48   : > { %1084 = vmatprep.mubr.bf16.mxu0 %v314_v20 }
  0x4f   : > { %1085 = vmatmul.mubr.bf16.gmra.mrb[8].mxu0 %v315_v21 }
  0x50   : > { %1088 = vmatprep.mubr.bf16.mxu0 %v316_v22 }
  0x57   : > { %1089 = vmatmul.mubr.bf16.gmra.mrb[12].mxu0 %v317_v23 }
 0x112   : > { %v1078_v25 = vpop.f32.mrb[0].mxu0 }
 0x113   : > { %v423_v27 = vpop.f32.mrb[1].mxu0  ;;  %v432_v29 = vadd.f32 %v1078_v25, %v1002_v26 }
 0x114   : > { %v1079_v28 = vpop.f32.mrb[2].mxu0  ;;  %v424_v32 = vadd.f32 %v1002_v26, %v423_v27 }
 0x115   : > { %v435_v30 = vadd.f32 %v1079_v28, %v1002_v26  ;;  %v426_v31 = vpop.f32.mrb[3].mxu0 }
 0x116   : > { %v427_v33 = vadd.f32 %v1002_v26, %v426_v31 }
 0x117   : > { %v487_v34 = vpack.c.bf16 %v435_v30, %v432_v29 }
 0x118   : > { %v486_v35 = vpack.c.bf16 %v427_v33, %v424_v32 }
 0x11a   : > { %v1082_v36 = vpop.f32.mrb[4].mxu0  ;;  %1092 = vmatprep.subr.bf16.mxu1 %v486_v35 }
 0x11b   : > { %v439_v37 = vpop.f32.mrb[5].mxu0  ;;  %1093 = vmatpush3.bf16.msra.mxu1 %v486_v35  ;;  %v448_v39 = vadd.f32 %v1082_v36, %v1002_v26 }
 0x11c   : > { %v1083_v38 = vpop.f32.mrb[6].mxu0  ;;  %1094 = vmatprep.subr.bf16.mxu1 %v487_v34  ;;  %v440_v42 = vadd.f32 %v1002_v26, %v439_v37 }
 0x11d   : > { %v451_v40 = vadd.f32 %v1083_v38, %v1002_v26  ;;  %v442_v41 = vpop.f32.mrb[7].mxu0 }
 0x11e   : > { %v443_v43 = vadd.f32 %v1002_v26, %v442_v41 }
 0x11f   : > { %v489_v44 = vpack.c.bf16 %v451_v40, %v448_v39  ;;  %1095 = vmatpush3.bf16.msra.mxu1 %v487_v34 }
 0x120   : > { %v488_v45 = vpack.c.bf16 %v443_v43, %v440_v42 }
 0x122   : > { %v1086_v46 = vpop.f32.mrb[8].mxu0  ;;  %1096 = vmatprep.subr.bf16.mxu1 %v488_v45 }
 0x123   : > { %v455_v47 = vpop.f32.mrb[9].mxu0  ;;  %1097 = vmatpush3.bf16.msra.mxu1 %v488_v45  ;;  %v464_v49 = vadd.f32 %v1086_v46, %v1002_v26 }
 0x124   : > { %v1087_v48 = vpop.f32.mrb[10].mxu0  ;;  %1098 = vmatprep.subr.bf16.mxu1 %v489_v44  ;;  %v456_v52 = vadd.f32 %v1002_v26, %v455_v47 }
 0x125   : > { %v467_v50 = vadd.f32 %v1087_v48, %v1002_v26  ;;  %v458_v51 = vpop.f32.mrb[11].mxu0 }
 0x126   : > { %v459_v53 = vadd.f32 %v1002_v26, %v458_v51 }
 0x127   : > { %v491_v54 = vpack.c.bf16 %v467_v50, %v464_v49  ;;  %1099 = vmatpush3.bf16.msra.mxu1 %v489_v44 }
 0x128   : > { %v490_v55 = vpack.c.bf16 %v459_v53, %v456_v52 }
 0x12a   : > { %v1090_v56 = vpop.f32.mrb[12].mxu0  ;;  %1100 = vmatprep.subr.bf16.mxu1 %v490_v55 }
 0x12b   : > { %v471_v57 = vpop.f32.mrb[13].mxu0  ;;  %1101 = vmatpush3.bf16.msra.mxu1 %v490_v55  ;;  %v480_v59 = vadd.f32 %v1090_v56, %v1002_v26 }
 0x12c   : > { %v1091_v58 = vpop.f32.mrb[14].mxu0  ;;  %1102 = vmatprep.subr.bf16.mxu1 %v491_v54  ;;  %v472_v62 = vadd.f32 %v1002_v26, %v471_v57 }
 0x12d   : > { %v483_v60 = vadd.f32 %v1091_v58, %v1002_v26  ;;  %v474_v61 = vpop.f32.mrb[15].mxu0 }
 0x12e   : > { %v475_v63 = vadd.f32 %v1002_v26, %v474_v61 }
 0x12f   : > { %v493_v0 = vpack.c.bf16 %v483_v60, %v480_v59  ;;  %1103 = vmatpush3.bf16.msra.mxu1 %v491_v54 }
 0x130   : > { %v492_v1 = vpack.c.bf16 %v475_v63, %v472_v62 }
 0x132   : > { %1104 = vmatprep.subr.bf16.mxu1 %v492_v1 }
 0x133   : > { %1105 = vmatpush3.bf16.msra.mxu1 %v492_v1 }
 0x134   : > { %1106 = vmatprep.subr.bf16.mxu1 %v493_v0 }
 0x137   : > { %1107 = vmatpush3.bf16.msra.mxu1 %v493_v0 }
 0x13a   : > { %1109 = vmatmul.mubr.bf16.vlgmr.msra.gmra.mrb[0].mxu1 %v1157_v2 }
 0x13b   : > { %1112 = vmatprep.mubr.bf16.mxu1 %v1158_v3 }
 0x142   : > { %1113 = vmatmul.mubr.bf16.gmra.mrb[4].mxu1 %v1159_v4 }
 0x143   : > { %1116 = vmatprep.mubr.bf16.mxu1 %v1160_v5 }
 0x14a   : > { %1117 = vmatmul.mubr.bf16.gmra.mrb[8].mxu1 %v1161_v6 }
 0x14b   : > { %1120 = vmatprep.mubr.bf16.mxu1 %v1162_v7 }
 0x152   : > { %1121 = vmatmul.mubr.bf16.gmra.mrb[12].mxu1 %v1163_v8 }
 0x20d   : > { %v1110_v10 = vpop.f32.mrb[0].mxu1 }
 0x20e   : > { %v1389_v11 = vadd.f32 %v1110_v10, %v1011_v9  ;;  %v620_v12 = vpop.f32.mrb[1].mxu1 }
 0x20f   : > { %v1391_v13 = vadd.f32 %v1011_v9, %v620_v12  ;;  %v1111_v14 = vpop.f32.mrb[2].mxu1 }
 0x210   : > { %v1393_v15 = vadd.f32 %v1111_v14, %v1011_v9  ;;  %v623_v16 = vpop.f32.mrb[3].mxu1  ;;  %v689_v44 = vmax.f32 (!%p1020_p6), %v1389_v11, 0.0 }
 0x211   : > { %v1395_v17 = vadd.f32 %v1011_v9, %v623_v16  ;;  %v687_v42 = vmax.f32 (!%p1020_p6), %v1391_v13, 0.0 }
 0x212   : > { %v690_v45 = vmax.f32 (!%p1020_p6), %v1393_v15, 0.0 }
 0x213   : > { %v688_v43 = vmax.f32 (!%p1020_p6), %v1395_v17, 0.0 }
 0x214   : > { %v704_v51 = vpack.c.bf16 (!%p1020_p6), %v690_v45, %v689_v44 }
 0x215   : > { %v1114_v18 = vpop.f32.mrb[4].mxu1  ;;  %v703_v50 = vpack.c.bf16 (!%p1020_p6), %v688_v43, %v687_v42 }
 0x216   : > { %v1397_v19 = vadd.f32 %v1114_v18, %v1011_v9  ;;  %v636_v20 = vpop.f32.mrb[5].mxu1  ;;  %716 = vst [vmem:[#allocation2 + $0x8] sm:$0xff] (!%p1020_p6), %v704_v51 }
 0x217   : > { %v1399_v21 = vadd.f32 %v1011_v9, %v636_v20  ;;  %v1115_v22 = vpop.f32.mrb[6].mxu1  ;;  %715 = vst [vmem:[#allocation2] sm:$0xff] (!%p1020_p6), %v703_v50 }
 0x218   : > { %v1401_v23 = vadd.f32 %v1115_v22, %v1011_v9  ;;  %v639_v24 = vpop.f32.mrb[7].mxu1  ;;  %v693_v48 = vmax.f32 (!%p1020_p6), %v1397_v19, 0.0 }
 0x219   : > { %v1403_v25 = vadd.f32 %v1011_v9, %v639_v24  ;;  %v691_v46 = vmax.f32 (!%p1020_p6), %v1399_v21, 0.0 }
 0x21a   : > { %v694_v49 = vmax.f32 (!%p1020_p6), %v1401_v23, 0.0 }
 0x21b   : > { %v692_v47 = vmax.f32 (!%p1020_p6), %v1403_v25, 0.0 }
 0x21c   : > { %v706_v55 = vpack.c.bf16 (!%p1020_p6), %v694_v49, %v693_v48 }
 0x21d   : > { %v1118_v26 = vpop.f32.mrb[8].mxu1  ;;  %v705_v54 = vpack.c.bf16 (!%p1020_p6), %v692_v47, %v691_v46 }
 0x21e   : > { %v1405_v27 = vadd.f32 %v1118_v26, %v1011_v9  ;;  %v652_v28 = vpop.f32.mrb[9].mxu1  ;;  %718 = vst [vmem:[#allocation2 + $0x18] sm:$0xff] (!%p1020_p6), %v706_v55 }
 0x21f   : > { %v1407_v29 = vadd.f32 %v1011_v9, %v652_v28  ;;  %v1119_v30 = vpop.f32.mrb[10].mxu1  ;;  %717 = vst [vmem:[#allocation2 + $0x10] sm:$0xff] (!%p1020_p6), %v705_v54 }
 0x220   : > { %v1409_v31 = vadd.f32 %v1119_v30, %v1011_v9  ;;  %v655_v32 = vpop.f32.mrb[11].mxu1  ;;  %v697_v56 = vmax.f32 (!%p1020_p6), %v1405_v27, 0.0 }
 0x221   : > { %v1411_v33 = vadd.f32 %v1011_v9, %v655_v32  ;;  %v695_v52 = vmax.f32 (!%p1020_p6), %v1407_v29, 0.0 }
 0x222   : > { %v698_v57 = vmax.f32 (!%p1020_p6), %v1409_v31, 0.0 }
 0x223   : > { %686 = sbr.rel (%p1020_p6) target bundleno = 560 (0x230), region = 83  ;;  %v696_v53 = vmax.f32 (!%p1020_p6), %v1411_v33, 0.0 }
 0x224   : > { %v708_v62 = vpack.c.bf16 (!%p1020_p6), %v698_v57, %v697_v56 }
 0x225   : > { %v1122_v34 = vpop.f32.mrb[12].mxu1  ;;  %v707_v58 = vpack.c.bf16 (!%p1020_p6), %v696_v53, %v695_v52 }
 0x226   : > { %v1413_v35 = vadd.f32 %v1122_v34, %v1011_v9  ;;  %v668_v36 = vpop.f32.mrb[13].mxu1  ;;  %720 = vst [vmem:[#allocation2 + $0x28] sm:$0xff] (!%p1020_p6), %v708_v62 }
 0x227   : > { %v1415_v37 = vadd.f32 %v1011_v9, %v668_v36  ;;  %v1123_v38 = vpop.f32.mrb[14].mxu1  ;;  %719 = vst [vmem:[#allocation2 + $0x20] sm:$0xff] (!%p1020_p6), %v707_v58 }
 0x228   : > { %v1417_v39 = vadd.f32 %v1123_v38, %v1011_v9  ;;  %v671_v40 = vpop.f32.mrb[15].mxu1  ;;  %v701_v61 = vmax.f32 (!%p1020_p6), %v1413_v35, 0.0 }
 0x229   : > { %v1419_v41 = vadd.f32 %v1011_v9, %v671_v40  ;;  %v699_v59 = vmax.f32 (!%p1020_p6), %v1415_v37, 0.0 }
 0x22a   : > { %v702_v63 = vmax.f32 %v1417_v39, 0.0 }
 0x22b   : > { %v700_v60 = vmax.f32 %v1419_v41, 0.0 }
 0x22c   : > { %v710_v1 = vpack.c.bf16 %v702_v63, %v701_v61 }
 0x22d   : > { %v709_v0 = vpack.c.bf16 %v700_v60, %v699_v59 }
 0x22e   : > { %722 = vst [vmem:[#allocation2 + $0x38] sm:$0xff] %v710_v1 }
 0x22f   : > { %721 = vst [vmem:[#allocation2 + $0x30] sm:$0xff] %v709_v0 }
 0x230 PF: > { %p1021_p7 = scmp.ne.s32.totalorder %s1244_s18, 2 }
 0x231   : > { %727 = vmax.xlane.f32.xlu0 (!%p1021_p7), %v1391_v13  ;;  %731 = vmax.xlane.f32.xlu1 (!%p1021_p7), %v1389_v11 }
 0x232   : > { %726 = sbr.rel (%p1021_p7) target bundleno = 908 (0x38c), region = 87 }
 0x235   : > { %729 = vmax.xlane.f32.xlu0 (!%p1021_p7), %v1395_v17  ;;  %733 = vmax.xlane.f32.xlu1 (!%p1021_p7), %v1393_v15 }
 0x239   : > { %735 = vmax.xlane.f32.xlu0 %v1399_v21  ;;  %737 = vmax.xlane.f32.xlu1 %v1403_v25 }
 0x23d   : > { %739 = vmax.xlane.f32.xlu0 %v1397_v19  ;;  %741 = vmax.xlane.f32.xlu1 %v1401_v23 }
 0x241   : > { %743 = vmax.xlane.f32.xlu0 %v1407_v29  ;;  %745 = vmax.xlane.f32.xlu1 %v1411_v33 }
 0x245   : > { %747 = vmax.xlane.f32.xlu0 %v1405_v27  ;;  %749 = vmax.xlane.f32.xlu1 %v1409_v31 }
 0x249   : > { %751 = vmax.xlane.f32.xlu0 %v1415_v37  ;;  %753 = vmax.xlane.f32.xlu1 %v1419_v41 }
 0x24d   : > { %755 = vmax.xlane.f32.xlu0 %v1413_v35  ;;  %757 = vmax.xlane.f32.xlu1 %v1417_v39 }
 0x2be   : > { %v728_v2 = vpop.xlane.xlu0 %727  ;;  %v732_v3 = vpop.xlane.xlu1 %731 }
 0x2bf   : > { %v1456_v4 = vsub.f32 %v1391_v13, %v728_v2  ;;  %v1459_v5 = vsub.f32 %v1389_v11, %v732_v3 }
 0x2c1   : > { %v775_v6 = vmul.f32 1.442695, %v1456_v4  ;;  %v779_v7 = vmul.f32 1.442695, %v1459_v5 }
 0x2c2   : > { %v730_v8 = vpop.xlane.xlu0 %729  ;;  %v734_v9 = vpop.xlane.xlu1 %733 }
 0x2c3   : > { %1164 = vpow2.f32 %v775_v6  ;;  %v1464_v10 = vsub.f32 %v1395_v17, %v730_v8  ;;  %v1467_v12 = vsub.f32 %v1393_v15, %v734_v9 }
 0x2c4   : > { %1166 = vpow2.f32 %v779_v7 }
 0x2c5   : > { %v777_v13 = vmul.f32 1.442695, %v1464_v10  ;;  %v781_v14 = vmul.f32 1.442695, %v1467_v12 }
 0x2c6   : > { %v736_v11 = vpop.xlane.xlu0 %735  ;;  %v738_v16 = vpop.xlane.xlu1 %737 }
 0x2c7   : > { %1168 = vpow2.f32 %v777_v13  ;;  %v1472_v18 = vsub.f32 %v1399_v21, %v736_v11  ;;  %v1475_v20 = vsub.f32 %v1403_v25, %v738_v16 }
 0x2c8   : > { %1170 = vpow2.f32 %v781_v14 }
 0x2c9   : > { %v783_v17 = vmul.f32 1.442695, %v1472_v18  ;;  %v785_v15 = vmul.f32 1.442695, %v1475_v20 }
 0x2ca   : > { %v740_v22 = vpop.xlane.xlu0 %739  ;;  %v742_v24 = vpop.xlane.xlu1 %741 }
 0x2cb   : > { %1172 = vpow2.f32 %v783_v17  ;;  %v1480_v26 = vsub.f32 %v1397_v19, %v740_v22  ;;  %v1483_v28 = vsub.f32 %v1401_v23, %v742_v24 }
 0x2cc   : > { %1174 = vpow2.f32 %v785_v15 }
 0x2cd   : > { %v1165_v30 = vpop.eup %1164  ;;  %v787_v21 = vmul.f32 1.442695, %v1480_v26  ;;  %v789_v25 = vmul.f32 1.442695, %v1483_v28 }
 0x2ce   : > { %807 = vadd.xlane.f32.xlu0 %v1165_v30  ;;  %v744_v32 = vpop.xlane.xlu0 %743  ;;  %v746_v34 = vpop.xlane.xlu1 %745 }
 0x2cf   : > { %v1167_v36 = vpop.eup %1166  ;;  %1176 = vpow2.f32 %v787_v21  ;;  %v1488_v38 = vsub.f32 %v1407_v29, %v744_v32  ;;  %v1491_v19 = vsub.f32 %v1411_v33, %v746_v34 }
 0x2d0   : > { %1178 = vpow2.f32 %v789_v25 }
 0x2d1   : > { %v1169_v40 = vpop.eup %1168  ;;  %v791_v23 = vmul.f32 1.442695, %v1488_v38  ;;  %v793_v42 = vmul.f32 1.442695, %v1491_v19 }
 0x2d2   : > { %811 = vadd.xlane.f32.xlu0 %v1167_v36  ;;  %809 = vadd.xlane.f32.xlu1 %v1169_v40  ;;  %v748_v43 = vpop.xlane.xlu0 %747  ;;  %v750_v44 = vpop.xlane.xlu1 %749 }
 0x2d3   : > { %v1171_v45 = vpop.eup %1170  ;;  %1180 = vpow2.f32 %v791_v23  ;;  %v1496_v46 = vsub.f32 %v1405_v27, %v748_v43  ;;  %v1499_v29 = vsub.f32 %v1409_v31, %v750_v44 }
 0x2d4   : > { %1182 = vpow2.f32 %v793_v42 }
 0x2d5   : > { %v1173_v33 = vpop.eup %1172  ;;  %v795_v47 = vmul.f32 1.442695, %v1496_v46  ;;  %v797_v48 = vmul.f32 1.442695, %v1499_v29 }
 0x2d6   : > { %813 = vadd.xlane.f32.xlu1 %v1171_v45  ;;  %815 = vadd.xlane.f32.xlu0 %v1173_v33  ;;  %v752_v49 = vpop.xlane.xlu0 %751  ;;  %v754_v50 = vpop.xlane.xlu1 %753 }
 0x2d7   : > { %v1175_v51 = vpop.eup %1174  ;;  %1184 = vpow2.f32 %v795_v47  ;;  %v1504_v52 = vsub.f32 %v1415_v37, %v752_v49  ;;  %v1507_v27 = vsub.f32 %v1419_v41, %v754_v50 }
 0x2d8   : > { %1186 = vpow2.f32 %v797_v48 }
 0x2d9   : > { %v1177_v31 = vpop.eup %1176  ;;  %v799_v53 = vmul.f32 1.442695, %v1504_v52  ;;  %v801_v54 = vmul.f32 1.442695, %v1507_v27 }
 0x2da   : > { %817 = vadd.xlane.f32.xlu1 %v1175_v51  ;;  %819 = vadd.xlane.f32.xlu0 %v1177_v31  ;;  %v756_v55 = vpop.xlane.xlu0 %755  ;;  %v758_v56 = vpop.xlane.xlu1 %757 }
 0x2db   : > { %v1179_v57 = vpop.eup %1178  ;;  %1188 = vpow2.f32 %v799_v53  ;;  %v1512_v58 = vsub.f32 %v1413_v35, %v756_v55  ;;  %v1515_v37 = vsub.f32 %v1417_v39, %v758_v56 }
 0x2dc   : > { %1190 = vpow2.f32 %v801_v54 }
 0x2dd   : > { %v1181_v41 = vpop.eup %1180  ;;  %v803_v59 = vmul.f32 1.442695, %v1512_v58  ;;  %v805_v60 = vmul.f32 1.442695, %v1515_v37 }
 0x2de   : > { %821 = vadd.xlane.f32.xlu1 %v1179_v57  ;;  %823 = vadd.xlane.f32.xlu0 %v1181_v41  ;;  %v1183_v61 = vpop.eup %1182 }
 0x2df   : > { %1192 = vpow2.f32 %v803_v59 }
 0x2e0   : > { %1194 = vpow2.f32 %v805_v60 }
 0x2e1   : > { %v1185_v62 = vpop.eup %1184 }
 0x2e2   : > { %825 = vadd.xlane.f32.xlu1 %v1183_v61  ;;  %827 = vadd.xlane.f32.xlu0 %v1185_v62  ;;  %v1187_v63 = vpop.eup %1186 }
 0x2e5   : > { %v1189_v35 = vpop.eup %1188 }
 0x2e6   : > { %829 = vadd.xlane.f32.xlu1 %v1187_v63  ;;  %831 = vadd.xlane.f32.xlu0 %v1189_v35  ;;  %v1191_v39 = vpop.eup %1190 }
 0x2e9   : > { %v1193_v0 = vpop.eup %1192 }
 0x2ea   : > { %833 = vadd.xlane.f32.xlu1 %v1191_v39  ;;  %835 = vadd.xlane.f32.xlu0 %v1193_v0  ;;  %v1195_v1 = vpop.eup %1194 }
 0x2ee   : > { %837 = vadd.xlane.f32.xlu1 %v1195_v1 }
 0x35b   : > { %v808_v2 = vpop.xlane.xlu0 %807 }
 0x35c   : > { %1196 = vlog2.f32 %v808_v2 }
 0x35f   : > { %v810_v3 = vpop.xlane.xlu1 %809  ;;  %v812_v6 = vpop.xlane.xlu0 %811 }
 0x360   : > { %1198 = vlog2.f32 %v810_v3 }
 0x361   : > { %1200 = vlog2.f32 %v812_v6 }
 0x363   : > { %v814_v7 = vpop.xlane.xlu1 %813  ;;  %v816_v8 = vpop.xlane.xlu0 %815 }
 0x364   : > { %1202 = vlog2.f32 %v814_v7 }
 0x365   : > { %1204 = vlog2.f32 %v816_v8 }
 0x366   : > { %v1197_v9 = vpop.eup %1196 }
 0x367   : > { %v840_v13 = vmul.f32 0.6931472, %v1197_v9  ;;  %v818_v14 = vpop.xlane.xlu1 %817  ;;  %v820_v11 = vpop.xlane.xlu0 %819 }
 0x368   : > { %1206 = vlog2.f32 %v818_v14 }
 0x369   : > { %v871_v16 = vsub.f32 %v1456_v4, %v840_v13  ;;  %1208 = vlog2.f32 %v820_v11 }
 0x36a   : > { %v1199_v17 = vpop.eup %1198 }
 0x36b   : > { %v1201_v15 = vpop.eup %1200  ;;  %887 = vst [vmem:[%s1597_s5] sm:$0xff] %v871_v16  ;;  %v842_v22 = vmul.f32 0.6931472, %v1199_v17  ;;  %v822_v24 = vpop.xlane.xlu1 %821 }
 0x36c   : > { %v824_v30 = vpop.xlane.xlu0 %823  ;;  %v844_v21 = vmul.f32 0.6931472, %v1201_v15  ;;  %1210 = vlog2.f32 %v822_v24 }
 0x36d   : > { %v872_v25 = vsub.f32 %v1464_v10, %v842_v22  ;;  %1212 = vlog2.f32 %v824_v30 }
 0x36e   : > { %v1203_v32 = vpop.eup %1202  ;;  %v873_v34 = vsub.f32 %v1459_v5, %v844_v21 }
 0x36f   : > { %v1205_v36 = vpop.eup %1204  ;;  %888 = vst [vmem:[%s1597_s5 + $0x8] sm:$0xff] %v872_v25  ;;  %v846_v4 = vmul.f32 0.6931472, %v1203_v32  ;;  %v826_v40 = vpop.xlane.xlu1 %825 }
 0x370   : > { %v828_v23 = vpop.xlane.xlu0 %827  ;;  %889 = vst [vmem:[%s1597_s5 + $0x10] sm:$0xff] %v873_v34  ;;  %v848_v42 = vmul.f32 0.6931472, %v1205_v36  ;;  %1214 = vlog2.f32 %v826_v40 }
 0x371   : > { %v874_v10 = vsub.f32 %v1467_v12, %v846_v4  ;;  %1216 = vlog2.f32 %v828_v23 }
 0x372   : > { %v1207_v43 = vpop.eup %1206  ;;  %v875_v5 = vsub.f32 %v1472_v18, %v848_v42 }
 0x373   : > { %v1209_v44 = vpop.eup %1208  ;;  %890 = vst [vmem:[%s1597_s5 + $0x18] sm:$0xff] %v874_v10  ;;  %v850_v45 = vmul.f32 0.6931472, %v1207_v43  ;;  %v830_v33 = vpop.xlane.xlu1 %829 }
 0x374   : > { %v832_v47 = vpop.xlane.xlu0 %831  ;;  %891 = vst [vmem:[%s1597_s5 + $0x20] sm:$0xff] %v875_v5  ;;  %v852_v48 = vmul.f32 0.6931472, %v1209_v44  ;;  %1218 = vlog2.f32 %v830_v33 }
 0x375   : > { %v876_v12 = vsub.f32 %v1475_v20, %v850_v45  ;;  %1220 = vlog2.f32 %v832_v47 }
 0x376   : > { %v1211_v49 = vpop.eup %1210  ;;  %v877_v18 = vsub.f32 %v1480_v26, %v852_v48 }
 0x377   : > { %v1213_v50 = vpop.eup %1212  ;;  %892 = vst [vmem:[%s1597_s5 + $0x28] sm:$0xff] %v876_v12  ;;  %v854_v51 = vmul.f32 0.6931472, %v1211_v49  ;;  %v834_v31 = vpop.xlane.xlu1 %833 }
 0x378   : > { %v836_v53 = vpop.xlane.xlu0 %835  ;;  %893 = vst [vmem:[%s1597_s5 + $0x30] sm:$0xff] %v877_v18  ;;  %v856_v54 = vmul.f32 0.6931472, %v1213_v50  ;;  %1222 = vlog2.f32 %v834_v31 }
 0x379   : > { %v878_v20 = vsub.f32 %v1483_v28, %v854_v51  ;;  %1224 = vlog2.f32 %v836_v53 }
 0x37a   : > { %v1215_v55 = vpop.eup %1214  ;;  %v879_v26 = vsub.f32 %v1488_v38, %v856_v54 }
 0x37b   : > { %v1217_v56 = vpop.eup %1216  ;;  %894 = vst [vmem:[%s1597_s5 + $0x38] sm:$0xff] %v878_v20  ;;  %v858_v57 = vmul.f32 0.6931472, %v1215_v55  ;;  %v838_v41 = vpop.xlane.xlu1 %837 }
 0x37c   : > { %895 = vst [vmem:[%s1597_s5 + $0x40] sm:$0xff] %v879_v26  ;;  %v860_v59 = vmul.f32 0.6931472, %v1217_v56  ;;  %1226 = vlog2.f32 %v838_v41 }
 0x37d   : > { %v880_v60 = vsub.f32 %v1491_v19, %v858_v57 }
 0x37e   : > { %v1219_v28 = vpop.eup %1218  ;;  %v881_v61 = vsub.f32 %v1496_v46, %v860_v59 }
 0x37f   : > { %v1221_v62 = vpop.eup %1220  ;;  %896 = vst [vmem:[%s1597_s5 + $0x48] sm:$0xff] %v880_v60  ;;  %v862_v38 = vmul.f32 0.6931472, %v1219_v28 }
 0x380   : > { %897 = vst [vmem:[%s1597_s5 + $0x50] sm:$0xff] %v881_v61  ;;  %v864_v63 = vmul.f32 0.6931472, %v1221_v62 }
 0x381   : > { %v882_v35 = vsub.f32 %v1499_v29, %v862_v38 }
 0x382   : > { %v1223_v39 = vpop.eup %1222  ;;  %v883_v0 = vsub.f32 %v1504_v52, %v864_v63 }
 0x383   : > { %v1225_v19 = vpop.eup %1224  ;;  %898 = vst [vmem:[%s1597_s5 + $0x58] sm:$0xff] %v882_v35  ;;  %v866_v46 = vmul.f32 0.6931472, %v1223_v39 }
 0x384   : > { %899 = vst [vmem:[%s1597_s5 + $0x60] sm:$0xff] %v883_v0  ;;  %v868_v1 = vmul.f32 0.6931472, %v1225_v19 }
 0x385   : > { %v884_v2 = vsub.f32 %v1507_v27, %v866_v46 }
 0x386   : > { %v1227_v3 = vpop.eup %1226  ;;  %v885_v6 = vsub.f32 %v1512_v58, %v868_v1 }
 0x387   : > { %900 = vst [vmem:[%s1597_s5 + $0x68] sm:$0xff] %v884_v2  ;;  %v870_v29 = vmul.f32 0.6931472, %v1227_v3 }
 0x388   : > { %901 = vst [vmem:[%s1597_s5 + $0x70] sm:$0xff] %v885_v6 }
 0x389   : > { %v886_v52 = vsub.f32 %v1515_v37, %v870_v29 }
 0x38b   : > { %902 = vst [vmem:[%s1597_s5 + $0x78] sm:$0xff] %v886_v52 }
 0x38c PF: > { %s15_s20 = sadd.s32 1, %s1252_s20   ;;  %s1598_s18 = smov %s1248_s19 }
 0x38d   : > { %p12_p8 = scmp.ge.s32.totalorder %s15_s20, 5   ;;  %s1599_s19 = smov %s1601_s21 }
 0x38f   :  { %14 = sbr.rel (!%p12_p8) target bundleno = 2 (0x2), region = 133 }

</bundles_post_ra>
